<compile_context>
chip_gen: v7x
topology: tpu7x:2x2x1
jax: 0.10.0
libtpu: 0.0.40
codegen_flags: <defaults>
</compile_context>

<pallas_src>
import jax
import jax.numpy as jnp
from jax.experimental import pallas as pl
from jax.experimental.pallas import tpu as pltpu


def _round_up(n, m):
    return ((n + m - 1) // m) * m


def _cdiv(a, b):
    return (a + b - 1) // b


def _pick_tile(total, target, quantum):
    """Largest multiple of `quantum` that divides `total` and is <= target."""
    target = max(quantum, min(target, total))
    best = quantum
    t = quantum
    while t <= target:
        if total % t == 0:
            best = t
        t += quantum
    return best


# ---------------------------------------------------------------------------
# Kernels
# ---------------------------------------------------------------------------

def fused_kernel(x_ref, w_ref, b_ref, out_ref):
    # Whole (affine) ClassBlock collapsed to one MXU pass: y = x @ W + b.
    out_ref[...] = (
        jnp.dot(x_ref[...].astype(jnp.bfloat16), w_ref[...],
                preferred_element_type=jnp.float32)
        + b_ref[...]
    ).astype(out_ref.dtype)


def twostage_kernel(x_ref, w1_ref, w2_ref, b2_ref, out_ref, h_ref):
    # grid = (batch tile i ["parallel"], class tile j ["arbitrary"]).
    # h = x @ w1_folded is computed once per batch tile (j == 0), cached in a
    # bf16 VMEM scratch and reused for every class tile j.
    @pl.when(pl.program_id(1) == 0)
    def _():
        h_ref[...] = jnp.dot(
            x_ref[...].astype(jnp.bfloat16), w1_ref[...],
            preferred_element_type=jnp.float32).astype(jnp.bfloat16)

    out_ref[...] = (
        jnp.dot(h_ref[...], w2_ref[...], preferred_element_type=jnp.float32)
        + b2_ref[...]
    ).astype(out_ref.dtype)


# ---------------------------------------------------------------------------
# Parameter preparation (one-time)
# ---------------------------------------------------------------------------

def prepare_params(params, eps=1e-5):
    w1, b1 = params["w1"], params["b1"]
    w2, b2 = params["w2"], params["b2"]
    gamma, beta = params["gamma"], params["beta"]
    mean, var = params["running_mean"], params["running_var"]

    scale = gamma * jax.lax.rsqrt(var + eps)      # (1, Nb)
    w1f = w1 * scale                              # (D, Nb)  BN folded into Linear
    b1f = (b1 - mean) * scale + beta              # (1, Nb)
    b_eff = b1f @ w2 + b2                         # (1, C)   b1 folded thru classifier (f32)

    D, Nb = w1f.shape
    C = w2.shape[1]
    D_pad, Nb_pad, C_pad = (_round_up(d, 128) for d in (D, Nb, C))

    fused = D * C < Nb * (D + C)   # single matmul cheaper than two

    out = dict(input_dim=D, class_num=C, d_pad=D_pad, c_pad=C_pad, fused=fused)
    out["b"] = jnp.zeros((1, C_pad), jnp.float32).at[:, :C].set(b_eff)
    if fused:
        w_eff = w1f @ w2                          # (D, C) in f32
        w_p = jnp.zeros((D_pad, C_pad), jnp.float32).at[:D, :C].set(w_eff)
        out["w"] = w_p.astype(jnp.bfloat16)
    else:
        w1_p = jnp.zeros((D_pad, Nb_pad), jnp.float32).at[:D, :Nb].set(w1f)
        w2_p = jnp.zeros((Nb_pad, C_pad), jnp.float32).at[:Nb, :C].set(w2)
        out["w1"] = w1_p.astype(jnp.bfloat16)
        out["w2"] = w2_p.astype(jnp.bfloat16)
        out["nb_pad"] = Nb_pad
    return out


# ---------------------------------------------------------------------------
# Forward wrapper
# ---------------------------------------------------------------------------

def _vmem_limit_bytes(bytes_needed):
    try:
        cap = int(pltpu.get_tpu_info().vmem_capacity_bytes)
    except Exception:
        cap = 64 * 2**20                       # conservative (v7x-sized) fallback
    # ~25% headroom for compiler scratch / DMA descriptors:
    #   v7x (64 MiB) -> <=48 MiB, v5e/v6e (128 MiB) -> <=96 MiB.
    return int(min(0.75 * cap, max(32 * 2**20, bytes_needed)))


def _spec(shape, index_map, *, constant, single_buffer):
    if constant and single_buffer:
        # Block index never changes -> one resident VMEM buffer, no double-buffer.
        return pl.BlockSpec(shape, index_map, pipeline_mode=pl.Buffered(1))
    return pl.BlockSpec(shape, index_map)


def class_block_forward(x, p, *, tm=512, tn=512):
    """x: [B, input_dim] f32 -> logits [B, class_num] f32 (eval-mode ClassBlock)."""
    B, D = x.shape
    assert D == p["input_dim"]
    D_pad, C_pad, C = p["d_pad"], p["c_pad"], p["class_num"]

    # Batch tiling: multiple of 16 so in-kernel bf16 tiles are full-sublane.
    TM = min(_round_up(tm, 16), _round_up(B, 16))
    n_bt = _cdiv(B, TM)
    if n_bt == 1 and B >= 32:
        # v7x megacore: make sure the "parallel" batch axis has >= 2 steps.
        TM = _round_up(_cdiv(B, 2), 16)
        n_bt = _cdiv(B, TM)
    B_pad = n_bt * TM

    # Class tiling: lane-dense multiples of 128 that divide C_pad.
    TN = _pick_tile(C_pad, _round_up(tn, 128), 128)
    n_ct = C_pad // TN

    # Stream x straight from HBM in f32 (cast to bf16 in-kernel); pad only if
    # the batch is ragged w.r.t. TM or the feature dim is not 128-aligned.
    if B_pad != B or D_pad != D:
        xp = jnp.zeros((B_pad, D_pad), x.dtype).at[:B, :D].set(x)
    else:
        xp = x

    x_const = n_bt == 1
    wt_const = n_ct == 1
    grid = (n_bt, n_ct)
    out_shape = jax.ShapeDtypeStruct((B_pad, C_pad), jnp.float32)
    out_spec = pl.BlockSpec((TM, TN), lambda i, j: (i, j))

    if p["fused"]:
        need = (2 * TM * D_pad * 4 + 2 * D_pad * TN * 2 + 2 * TN * 4
                + 2 * TM * TN * 4 + TM * TN * 4)

        def run(single_buffer):
            return pl.pallas_call(
                fused_kernel,
                out_shape=out_shape,
                grid=grid,
                in_specs=[
                    _spec((TM, D_pad), lambda i, j: (i, 0),
                          constant=x_const, single_buffer=single_buffer),
                    _spec((D_pad, TN), lambda i, j: (0, j),
                          constant=wt_const, single_buffer=single_buffer),
                    _spec((1, TN), lambda i, j: (0, j),
                          constant=wt_const, single_buffer=single_buffer),
                ],
                out_specs=out_spec,
                compiler_params=pltpu.CompilerParams(
                    dimension_semantics=("parallel", "parallel"),
                    vmem_limit_bytes=_vmem_limit_bytes(int(1.25 * need)),
                ),
            )(xp, p["w"], p["b"])
    else:
        Nb_pad = p["nb_pad"]
        need = (2 * TM * D_pad * 4 + 2 * D_pad * Nb_pad * 2
                + 2 * Nb_pad * TN * 2 + 2 * TN * 4 + 2 * TM * TN * 4
                + TM * Nb_pad * 2 + TM * max(Nb_pad, TN) * 4)

        def run(single_buffer):
            return pl.pallas_call(
                twostage_kernel,
                out_shape=out_shape,
                grid=grid,
                in_specs=[
                    _spec((TM, D_pad), lambda i, j: (i, 0),
                          constant=x_const, single_buffer=single_buffer),
                    _spec((D_pad, Nb_pad), lambda i, j: (0, 0),
                          constant=True, single_buffer=single_buffer),
                    _spec((Nb_pad, TN), lambda i, j: (0, j),
                          constant=wt_const, single_buffer=single_buffer),
                    _spec((1, TN), lambda i, j: (0, j),
                          constant=wt_const, single_buffer=single_buffer),
                ],
                out_specs=out_spec,
                scratch_shapes=[pltpu.VMEM((TM, Nb_pad), jnp.bfloat16)],
                compiler_params=pltpu.CompilerParams(
                    # class axis carries the cached h -> sequential per core.
                    dimension_semantics=("parallel", "arbitrary"),
                    vmem_limit_bytes=_vmem_limit_bytes(int(1.25 * need)),
                ),
            )(xp, p["w1"], p["w2"], p["b"])

    try:
        out_pad = run(True)
    except Exception:
        # pl.Buffered(1) (single-buffered resident weights) not supported on
        # this jax version -> fall back to default double buffering.
        out_pad = run(False)

    return out_pad[:B, :C]


# ---------------------------------------------------------------------------
# Reference / test
# ---------------------------------------------------------------------------

def init_params(key, input_dim, class_num, num_bottleneck, random_bn=False):
    k1, k2, k3, k4, k5, k6 = jax.random.split(key, 6)
    # weights_init_kaiming on Linear: normal(std=0.001), bias=0
    w1 = (0.001 * jax.random.normal(k1, (input_dim, num_bottleneck))).astype(jnp.float32)
    b1 = jnp.zeros((1, num_bottleneck), jnp.float32)
    if random_bn:
        # Non-trivial running stats / affine params to exercise the BN fold.
        gamma = (1.0 + 0.2 * jax.random.normal(k3, (1, num_bottleneck))).astype(jnp.float32)
        beta = (0.1 * jax.random.normal(k4, (1, num_bottleneck))).astype(jnp.float32)
        running_mean = (0.1 * jax.random.normal(k5, (1, num_bottleneck))).astype(jnp.float32)
        running_var = (1.0 + 0.3 * jax.random.uniform(k6, (1, num_bottleneck))).astype(jnp.float32)
    else:
        # PyTorch BatchNorm1d defaults (weights_init_kaiming only touches
        # 'SyncBatchNorm2d', not 'BatchNorm1d').
        gamma = jnp.ones((1, num_bottleneck), jnp.float32)
        beta = jnp.zeros((1, num_bottleneck), jnp.float32)
        running_mean = jnp.zeros((1, num_bottleneck), jnp.float32)
        running_var = jnp.ones((1, num_bottleneck), jnp.float32)
    # weights_init_classifier on Linear: normal(std=0.001), bias=0
    w2 = (0.001 * jax.random.normal(k2, (num_bottleneck, class_num))).astype(jnp.float32)
    b2 = jnp.zeros((1, class_num), jnp.float32)
    return dict(w1=w1, b1=b1, gamma=gamma, beta=beta,
                running_mean=running_mean, running_var=running_var,
                w2=w2, b2=b2)


def class_block_ref(x, p, eps=1e-5):
    # Pure-f32 reference of the original (unfolded) eval-mode math.
    h = x @ p["w1"] + p["b1"]
    h = (h - p["running_mean"]) * jax.lax.rsqrt(p["running_var"] + eps) * p["gamma"] + p["beta"]
    # Dropout(p=0.5) -> identity in eval; relu=False -> no LeakyReLU.
    return h @ p["w2"] + p["b2"]


if __name__ == "__main__":
    key = jax.random.PRNGKey(0)

    # Test 1: small class_num -> fused single-matmul path (default BN stats,
    # i.e. exactly a freshly-initialized PyTorch ClassBlock in eval mode).
    B1, D1, Nb1, C1 = 8, 256, 512, 128
    k1, k2, key = jax.random.split(key, 3)
    x1 = jax.random.normal(k1, (B1, D1), jnp.float32)
    params1 = init_params(k2, D1, C1, Nb1, random_bn=False)
    prepped1 = prepare_params(params1)
    assert prepped1["fused"]
    out1 = jax.block_until_ready(class_block_forward(x1, prepped1))
    ref1 = class_block_ref(x1, params1)
    assert out1.shape == (B1, C1)
    assert jnp.allclose(out1, ref1, atol=2e-4, rtol=2e-2), \
        float(jnp.max(jnp.abs(out1 - ref1)))

    # Test 2: class_num large relative to the bottleneck -> two-matmul path
    # with class-dim tiling, unaligned batch/feature/bottleneck dims and
    # non-trivial BatchNorm running stats.
    B2, D2, Nb2, C2 = 40, 96, 48, 320
    k3, k4 = jax.random.split(key)
    x2 = jax.random.normal(k3, (B2, D2), jnp.float32)
    params2 = init_params(k4, D2, C2, Nb2, random_bn=True)
    prepped2 = prepare_params(params2)
    assert not prepped2["fused"]
    out2 = jax.block_until_ready(class_block_forward(x2, prepped2, tn=128))
    ref2 = class_block_ref(x2, params2)
    assert out2.shape == (B2, C2)
    assert jnp.allclose(out2, ref2, atol=2e-4, rtol=2e-2), \
        float(jnp.max(jnp.abs(out2 - ref2)))

    print("KERNEL_OK")
</pallas_src>

<mosaic_0001>
module attributes {stable_mosaic.version = 11 : i64} {
  func.func @fused_kernel(%arg0: i32, %arg1: i32, %arg2: memref<16x256xf32, #tpu.memory_space<vmem>>, %arg3: memref<256x128xbf16, #tpu.memory_space<vmem>>, %arg4: memref<1x128xf32, #tpu.memory_space<vmem>>, %arg5: memref<16x128xf32, #tpu.memory_space<vmem>>) attributes {dimension_semantics = [#tpu.dimension_semantics<parallel>, #tpu.dimension_semantics<parallel>], iteration_bounds = array<i64: 1, 1>, scalar_prefetch = 0 : i64, scratch_operands = 0 : i64, tpu.core_type = #tpu.core_type<tc>, window_params = [{pipeline_mode = #tpu.pipeline_mode<synchronous>, transform_indices = @transform_0, window_bounds = array<i64: 16, 256>}, {pipeline_mode = #tpu.pipeline_mode<synchronous>, transform_indices = @transform_1, window_bounds = array<i64: 256, 128>}, {pipeline_mode = #tpu.pipeline_mode<synchronous>, transform_indices = @transform_2, window_bounds = array<i64: 1, 128>}, {transform_indices = @transform_3, window_bounds = array<i64: 16, 128>}]} {
    %c0 = arith.constant 0 : index
    %c0_0 = arith.constant 0 : index
    %0 = vector.load %arg2[%c0, %c0_0] : memref<16x256xf32, #tpu.memory_space<vmem>>, vector<16x256xf32>
    %1 = arith.truncf %0 : vector<16x256xf32> to vector<16x256xbf16>
    %c0_1 = arith.constant 0 : index
    %c0_2 = arith.constant 0 : index
    %2 = vector.load %arg3[%c0_1, %c0_2] : memref<256x128xbf16, #tpu.memory_space<vmem>>, vector<256x128xbf16>
    %cst = arith.constant dense<0.000000e+00> : vector<16x128xf32>
    %3 = tpu.matmul %1, %2, %cst {dimension_numbers = #tpu.dot_dimension_numbers<[1], [0], [0], [1], [0, 0, 1, 1], [], []>} : vector<16x256xbf16>, vector<256x128xbf16>, vector<16x128xf32> -> vector<16x128xf32>
    %c0_3 = arith.constant 0 : index
    %c0_4 = arith.constant 0 : index
    %4 = vector.load %arg4[%c0_3, %c0_4] : memref<1x128xf32, #tpu.memory_space<vmem>>, vector<1x128xf32>
    %5 = vector.broadcast %4 : vector<1x128xf32> to vector<16x128xf32>
    %6 = arith.addf %3, %5 : vector<16x128xf32>
    %c0_5 = arith.constant 0 : index
    %c0_6 = arith.constant 0 : index
    %7 = vector.load %arg5[%c0_5, %c0_6] : memref<16x128xf32, #tpu.memory_space<vmem>>, vector<16x128xf32>
    tpu.vector_store %arg5[%c0_5, %c0_6], %6 {strides = array<i32>} : memref<16x128xf32, #tpu.memory_space<vmem>>, vector<16x128xf32>,
    return
  }
  func.func @transform_0(%arg0: i32, %arg1: i32) -> (i32, i32) {
    %c0_i32 = arith.constant 0 : i32
    %c0_i32_0 = arith.constant 0 : i32
    return %arg0, %c0_i32 : i32, i32
  }
  func.func @transform_1(%arg0: i32, %arg1: i32) -> (i32, i32) {
    %c0_i32 = arith.constant 0 : i32
    %c0_i32_0 = arith.constant 0 : i32
    return %c0_i32, %arg1 : i32, i32
  }
  func.func @transform_2(%arg0: i32, %arg1: i32) -> (i32, i32) {
    %c0_i32 = arith.constant 0 : i32
    %c0_i32_0 = arith.constant 0 : i32
    return %c0_i32, %arg1 : i32, i32
  }
  func.func @transform_3(%arg0: i32, %arg1: i32) -> (i32, i32) {
    %c0_i32 = arith.constant 0 : i32
    return %arg0, %arg1 : i32, i32
  }
}

module attributes {stable_mosaic.version = 11 : i64} {
  func.func @fused_kernel(%arg0: i32, %arg1: i32, %arg2: memref<16x256xf32, #tpu.memory_space<vmem>>, %arg3: memref<256x128xbf16, #tpu.memory_space<vmem>>, %arg4: memref<1x128xf32, #tpu.memory_space<vmem>>, %arg5: memref<16x128xf32, #tpu.memory_space<vmem>>) attributes {dimension_semantics = [#tpu.dimension_semantics<parallel>, #tpu.dimension_semantics<parallel>], iteration_bounds = array<i64: 1, 1>, scalar_prefetch = 0 : i64, scratch_operands = 0 : i64, tpu.core_type = #tpu.core_type<tc>, window_params = [{transform_indices = @transform_0, window_bounds = array<i64: 16, 256>}, {transform_indices = @transform_1, window_bounds = array<i64: 256, 128>}, {transform_indices = @transform_2, window_bounds = array<i64: 1, 128>}, {transform_indices = @transform_3, window_bounds = array<i64: 16, 128>}]} {
    %c0 = arith.constant 0 : index
    %c0_0 = arith.constant 0 : index
    %0 = vector.load %arg2[%c0, %c0_0] : memref<16x256xf32, #tpu.memory_space<vmem>>, vector<16x256xf32>
    %1 = arith.truncf %0 : vector<16x256xf32> to vector<16x256xbf16>
    %c0_1 = arith.constant 0 : index
    %c0_2 = arith.constant 0 : index
    %2 = vector.load %arg3[%c0_1, %c0_2] : memref<256x128xbf16, #tpu.memory_space<vmem>>, vector<256x128xbf16>
    %cst = arith.constant dense<0.000000e+00> : vector<16x128xf32>
    %3 = tpu.matmul %1, %2, %cst {dimension_numbers = #tpu.dot_dimension_numbers<[1], [0], [0], [1], [0, 0, 1, 1], [], []>} : vector<16x256xbf16>, vector<256x128xbf16>, vector<16x128xf32> -> vector<16x128xf32>
    %c0_3 = arith.constant 0 : index
    %c0_4 = arith.constant 0 : index
    %4 = vector.load %arg4[%c0_3, %c0_4] : memref<1x128xf32, #tpu.memory_space<vmem>>, vector<1x128xf32>
    %5 = vector.broadcast %4 : vector<1x128xf32> to vector<16x128xf32>
    %6 = arith.addf %3, %5 : vector<16x128xf32>
    %c0_5 = arith.constant 0 : index
    %c0_6 = arith.constant 0 : index
    %7 = vector.load %arg5[%c0_5, %c0_6] : memref<16x128xf32, #tpu.memory_space<vmem>>, vector<16x128xf32>
    tpu.vector_store %arg5[%c0_5, %c0_6], %6 {strides = array<i32>} : memref<16x128xf32, #tpu.memory_space<vmem>>, vector<16x128xf32>,
    return
  }
  func.func @transform_0(%arg0: i32, %arg1: i32) -> (i32, i32) {
    %c0_i32 = arith.constant 0 : i32
    %c0_i32_0 = arith.constant 0 : i32
    return %arg0, %c0_i32 : i32, i32
  }
  func.func @transform_1(%arg0: i32, %arg1: i32) -> (i32, i32) {
    %c0_i32 = arith.constant 0 : i32
    %c0_i32_0 = arith.constant 0 : i32
    return %c0_i32, %arg1 : i32, i32
  }
  func.func @transform_2(%arg0: i32, %arg1: i32) -> (i32, i32) {
    %c0_i32 = arith.constant 0 : i32
    %c0_i32_0 = arith.constant 0 : i32
    return %c0_i32, %arg1 : i32, i32
  }
  func.func @transform_3(%arg0: i32, %arg1: i32) -> (i32, i32) {
    %c0_i32 = arith.constant 0 : i32
    return %arg0, %arg1 : i32, i32
  }
}

</mosaic_0001>

<bundles_post_ra>
// kernel: tpu_custom_call.1
= control target key start
LH: loop header
LB: loop body
LE: loop exit
PB: predicated region body
PF: predicated region fallthrough
CT: control target
= control target key end

     0   :  { %8 = vsyncpa [#allocation3], 0  ;;  %s450_s0 = inlined_call_operand.hbm [shape: f32[16,256], index: 0, kind: input, shape index: {}]   ;;  %s451_s1 = inlined_call_operand.hbm [shape: bf16[256,128], index: 1, kind: input, shape index: {}]   ;;  %s452_s2 = inlined_call_operand.vmem [shape: f32[1,128], index: 2, kind: input, shape index: {}]   ;;  %s453_s3 = inlined_call_operand.hbm [shape: f32[16,128], index: 3, kind: output, shape index: {}]  }
   0x1   :  { %9 = vsyncpa [#allocation6], 0 }
   0x2   :  { %10 = vsyncpa [#allocation4], 0  ;;  %s382_s12 = smov [#allocation2]   ;;  %s310_s16 = scalar_lea.hbm %s450_s0, 512 }
   0x3   :  { %s16_s13 = sshll.u32 %s382_s12, 4  ;;  %p311_p0 = scmp.ne.s32.totalorder %s450_s0, %s310_s16  ;;  %s17_s13 = int_to_ptr.vmem [resolvable:$true] %s16_s13 }
   0x4   :  { %p314_p1 = scmp.lt.u32.totalorder %s310_s16, %s450_s0 }
   0x6   :  { %p316_p2 = pnand %p314_p1, %p311_p0 }
   0x8   :  { %319 = shalt.err (!%p316_p2)
}
   0x9   :  { %s320_s21 = scalar_lea.vmem %s17_s13, 512  ;;  %p325_p4 = scmp.lt.s32.totalorder %s17_s13, %s17_s13 }
   0xa   :  { %p321_p3 = scmp.ne.s32.totalorder %s17_s13, %s320_s21  ;;  %p326_p5 = scmp.lt.s32.totalorder %s320_s21, %s320_s21 }
   0xc   :  { %p327_p6 = por %p326_p5, %p325_p4 }
   0xe   :  { %p328_p7 = pnand %p327_p6, %p321_p3 }
  0x10   :  { %331 = shalt.err (!%p328_p7)
}
  0x11   :  { %s383_s22 = smov 256   ;;  %s384_s23 = smov 16  }
  0x12   :  { %22 = dma.hbm_to_vmem [thread:$0]  %s450_s0, 512, %s17_s13, [#allocation3], %s383_s22, %s383_s22, %s384_s23  }
  0x13   :  { %s385_s26 = smov [#allocation5]   ;;  %s332_s30 = scalar_lea.hbm %s451_s1, 2048 }
  0x14   :  { %s28_s27 = sshll.u32 %s385_s26, 4  ;;  %p333_p8 = scmp.ne.s32.totalorder %s451_s1, %s332_s30  ;;  %s29_s27 = int_to_ptr.vmem [resolvable:$true] %s28_s27 }
  0x15   :  { %p336_p9 = scmp.lt.u32.totalorder %s332_s30, %s451_s1 }
  0x17   :  { %p338_p10 = pnand %p336_p9, %p333_p8 }
  0x19   :  { %341 = shalt.err (!%p338_p10)
}
  0x1a   :  { %s342_s8 = scalar_lea.vmem %s29_s27, 2048  ;;  %p347_p12 = scmp.lt.s32.totalorder %s29_s27, %s29_s27 }
  0x1b   :  { %p343_p11 = scmp.ne.s32.totalorder %s29_s27, %s342_s8  ;;  %p348_p13 = scmp.lt.s32.totalorder %s342_s8, %s342_s8 }
  0x1d   :  { %p349_p0 = por %p348_p13, %p347_p12 }
  0x1f   :  { %p350_p1 = pnand %p349_p0, %p343_p11 }
  0x21   :  { %353 = shalt.err (!%p350_p1)
}
  0x22   :  { %s386_s0 = smov 64   ;;  %s387_s9 = smov 4  }
  0x23   :  { %34 = dma.hbm_to_vmem [thread:$0]  %s451_s1, 2048, %s29_s27, [#allocation6], %s386_s0, %s386_s0, %s387_s9  }
  0x24   :  { %376 = dma.done.wait [#allocation3], 512  }
  0x25   :  { %377 = vsyncadd [#allocation3], 4294966784 }
  0x26   :  { %378 = dma.done.wait [#allocation6], 2048  }
  0x27   :  { %379 = vsyncadd [#allocation6], 4294965248  ;;  %v294_v0 = vld [vmem:[#allocation5 + $0x40] sm:$0xff]   ;;  %v296_v2 = vld [vmem:[#allocation5 + $0x48] sm:$0xff]   ;;  %s388_s13 = smov [#allocation7]  }
  0x28   :  { %v295_v1 = vld [vmem:[#allocation5] sm:$0xff]   ;;  %263 = vmatprep.subr.bf16.mxu0 %v294_v0  ;;  %v297_v3 = vld [vmem:[#allocation5 + $0x8] sm:$0xff]   ;;  %v298_v4 = vld [vmem:[#allocation5 + $0x50] sm:$0xff]   ;;  %s233_s14 = sshll.u32 %s388_s13, 4  ;;  %s234_s14 = int_to_ptr.vmem [resolvable:$true] %s233_s14 }
  0x29   :  { %264 = vmatpush3.bf16.msra.mxu0 %v295_v1  ;;  %v299_v5 = vld [vmem:[#allocation5 + $0x10] sm:$0xff]   ;;  %v300_v6 = vld [vmem:[#allocation5 + $0x58] sm:$0xff]   ;;  %v302_v8 = vld [vmem:[#allocation5 + $0x60] sm:$0xff]   ;;  %s354_s15 = scalar_lea.vmem %s234_s14, 256  ;;  %p359_p3 = scmp.lt.s32.totalorder %s234_s14, %s234_s14 }
  0x2a   :  { %265 = vmatprep.subr.bf16.mxu0 %v296_v2  ;;  %v301_v7 = vld [vmem:[#allocation5 + $0x18] sm:$0xff]   ;;  %v303_v9 = vld [vmem:[#allocation5 + $0x20] sm:$0xff]   ;;  %v304_v10 = vld [vmem:[#allocation5 + $0x68] sm:$0xff]   ;;  %p355_p2 = scmp.ne.s32.totalorder %s234_s14, %s354_s15  ;;  %p360_p4 = scmp.lt.s32.totalorder %s354_s15, %s354_s15 }
  0x2b   :  { %v45_v11 = vld [vmem:[#allocation2 + $0x8] sm:$0xff]  ;;  %v47_v12 = vld [vmem:[#allocation2 + $0x18] sm:$0xff]  ;;  %v306_v15 = vld [vmem:[#allocation5 + $0x70] sm:$0xff]  }
  0x2c   :  { %v49_v13 = vpack.c.bf16 %v47_v12, %v45_v11  ;;  %v305_v14 = vld [vmem:[#allocation5 + $0x28] sm:$0xff]   ;;  %v307_v16 = vld [vmem:[#allocation5 + $0x30] sm:$0xff]   ;;  %v308_v17 = vld [vmem:[#allocation5 + $0x78] sm:$0xff]   ;;  %p361_p5 = por %p360_p4, %p359_p3 }
  0x2d   :  { %266 = vmatpush3.bf16.msra.mxu0 %v297_v3  ;;  %v309_v18 = vld [vmem:[#allocation5 + $0x38] sm:$0xff]   ;;  %v44_v19 = vld [vmem:[#allocation2] sm:$0xff]  ;;  %v46_v20 = vld [vmem:[#allocation2 + $0x10] sm:$0xff] }
  0x2e   :  { %267 = vmatprep.subr.bf16.mxu0 %v298_v4  ;;  %217 = vmatprep.mubr.bf16.mxu0 %v49_v13  ;;  %v48_v21 = vpack.c.bf16 %v46_v20, %v44_v19  ;;  %v246_v23 = vld [vmem:[%s452_s2] ss:$0 sm:$0xff]  ;;  %p362_p6 = pnand %p361_p5, %p355_p2 }
  0x31   :  { %268 = vmatpush3.bf16.msra.mxu0 %v299_v5 }
  0x32   :  { %269 = vmatprep.subr.bf16.mxu0 %v300_v6 }
  0x35   :  { %270 = vmatpush3.bf16.msra.mxu0 %v301_v7 }
  0x36   :  { %271 = vmatprep.subr.bf16.mxu0 %v302_v8 }
  0x39   :  { %272 = vmatpush3.bf16.msra.mxu0 %v303_v9 }
  0x3a   :  { %273 = vmatprep.subr.bf16.mxu0 %v304_v10 }
  0x3d   :  { %274 = vmatpush3.bf16.msra.mxu0 %v305_v14 }
  0x3e   :  { %275 = vmatprep.subr.bf16.mxu0 %v306_v15 }
  0x41   :  { %276 = vmatpush3.bf16.msra.mxu0 %v307_v16 }
  0x42   :  { %277 = vmatprep.subr.bf16.mxu0 %v308_v17 }
  0x45   :  { %278 = vmatpush3.bf16.msra.mxu0 %v309_v18 }
  0x48   :  { %218 = vmatmul.mubr.bf16.vlgmr.msra.gmra.mrb[0].mxu0 %v48_v21 }
 0x11b   :  { %v279_v22 = vpop.f32.mrb[0].mxu0 }
 0x11c   :  { %v280_v24 = vpop.f32.mrb[1].mxu0 }
 0x11d   :  { %v281_v25 = vadd.f32 %v280_v24, %v279_v22  ;;  %v282_v26 = vpop.f32.mrb[2].mxu0 }
 0x11e   :  { %v283_v27 = vpop.f32.mrb[3].mxu0 }
 0x11f   :  { %v220_v28 = vadd.f32 %v281_v25, %v246_v23  ;;  %v284_v29 = vadd.f32 %v283_v27, %v282_v26 }
 0x121   :  { %226 = vst [vmem:[#allocation7] sm:$0xff] %v220_v28  ;;  %v223_v30 = vadd.f32 %v284_v29, %v246_v23 }
 0x123   :  { %227 = vst [vmem:[#allocation7 + $0x8] sm:$0xff] %v223_v30 }
 0x124   :  { %365 = shalt.err (!%p362_p6)
}
 0x125   :  { %s366_s17 = scalar_lea.hbm %s453_s3, 256 }
 0x126   :  { %p367_p7 = scmp.ne.s32.totalorder %s453_s3, %s366_s17  ;;  %p370_p8 = scmp.lt.u32.totalorder %s366_s17, %s453_s3 }
 0x128   :  { %p372_p9 = pnand %p370_p8, %p367_p7 }
 0x12a   :  { %375 = shalt.err (!%p372_p9)
}
 0x12b   :  { %s389_s22 = smov 128   ;;  %s390_s23 = smov 8  }
 0x12c   :  { %239 = dma.vmem_to_hbm [thread:$0]  %s234_s14, 256, %s453_s3, [#allocation4], %s389_s22, %s389_s22, %s390_s23  }
 0x12d   :  { %380 = dma.done.wait [#allocation4], 256  }
 0x12e   :  { %381 = vsyncadd [#allocation4], 4294967040 }
 0x12f   :  { %243 = vsyncpa [#allocation3], 1 }
 0x130   :  { %244 = vsyncpa [#allocation6], 1 }
 0x131   :  { %245 = vsyncpa [#allocation4], 1 }

// kernel: tpu_custom_call.1
= control target key start
LH: loop header
LB: loop body
LE: loop exit
PB: predicated region body
PF: predicated region fallthrough
CT: control target
= control target key end

     0   :  { %8 = vsyncpa [#allocation3], 0  ;;  %s450_s0 = inlined_call_operand.hbm [shape: f32[16,256], index: 0, kind: input, shape index: {}]   ;;  %s451_s1 = inlined_call_operand.hbm [shape: bf16[256,128], index: 1, kind: input, shape index: {}]   ;;  %s452_s2 = inlined_call_operand.vmem [shape: f32[1,128], index: 2, kind: input, shape index: {}]   ;;  %s453_s3 = inlined_call_operand.hbm [shape: f32[16,128], index: 3, kind: output, shape index: {}]  }
   0x1   :  { %9 = vsyncpa [#allocation6], 0 }
   0x2   :  { %10 = vsyncpa [#allocation4], 0  ;;  %s382_s12 = smov [#allocation2]   ;;  %s310_s16 = scalar_lea.hbm %s450_s0, 512 }
   0x3   :  { %s16_s13 = sshll.u32 %s382_s12, 4  ;;  %p311_p0 = scmp.ne.s32.totalorder %s450_s0, %s310_s16  ;;  %s17_s13 = int_to_ptr.vmem [resolvable:$true] %s16_s13 }
   0x4   :  { %p314_p1 = scmp.lt.u32.totalorder %s310_s16, %s450_s0 }
   0x6   :  { %p316_p2 = pnand %p314_p1, %p311_p0 }
   0x8   :  { %319 = shalt.err (!%p316_p2)
}
   0x9   :  { %s320_s21 = scalar_lea.vmem %s17_s13, 512  ;;  %p325_p4 = scmp.lt.s32.totalorder %s17_s13, %s17_s13 }
   0xa   :  { %p321_p3 = scmp.ne.s32.totalorder %s17_s13, %s320_s21  ;;  %p326_p5 = scmp.lt.s32.totalorder %s320_s21, %s320_s21 }
   0xc   :  { %p327_p6 = por %p326_p5, %p325_p4 }
   0xe   :  { %p328_p7 = pnand %p327_p6, %p321_p3 }
  0x10   :  { %331 = shalt.err (!%p328_p7)
}
  0x11   :  { %s383_s22 = smov 256   ;;  %s384_s23 = smov 16  }
  0x12   :  { %22 = dma.hbm_to_vmem [thread:$0]  %s450_s0, 512, %s17_s13, [#allocation3], %s383_s22, %s383_s22, %s384_s23  }
  0x13   :  { %s385_s26 = smov [#allocation5]   ;;  %s332_s30 = scalar_lea.hbm %s451_s1, 2048 }
  0x14   :  { %s28_s27 = sshll.u32 %s385_s26, 4  ;;  %p333_p8 = scmp.ne.s32.totalorder %s451_s1, %s332_s30  ;;  %s29_s27 = int_to_ptr.vmem [resolvable:$true] %s28_s27 }
  0x15   :  { %p336_p9 = scmp.lt.u32.totalorder %s332_s30, %s451_s1 }
  0x17   :  { %p338_p10 = pnand %p336_p9, %p333_p8 }
  0x19   :  { %341 = shalt.err (!%p338_p10)
}
  0x1a   :  { %s342_s8 = scalar_lea.vmem %s29_s27, 2048  ;;  %p347_p12 = scmp.lt.s32.totalorder %s29_s27, %s29_s27 }
  0x1b   :  { %p343_p11 = scmp.ne.s32.totalorder %s29_s27, %s342_s8  ;;  %p348_p13 = scmp.lt.s32.totalorder %s342_s8, %s342_s8 }
  0x1d   :  { %p349_p0 = por %p348_p13, %p347_p12 }
  0x1f   :  { %p350_p1 = pnand %p349_p0, %p343_p11 }
  0x21   :  { %353 = shalt.err (!%p350_p1)
}
  0x22   :  { %s386_s0 = smov 64   ;;  %s387_s9 = smov 4  }
  0x23   :  { %34 = dma.hbm_to_vmem [thread:$0]  %s451_s1, 2048, %s29_s27, [#allocation6], %s386_s0, %s386_s0, %s387_s9  }
  0x24   :  { %376 = dma.done.wait [#allocation3], 512  }
  0x25   :  { %377 = vsyncadd [#allocation3], 4294966784 }
  0x26   :  { %378 = dma.done.wait [#allocation6], 2048  }
  0x27   :  { %379 = vsyncadd [#allocation6], 4294965248  ;;  %v294_v0 = vld [vmem:[#allocation5 + $0x40] sm:$0xff]   ;;  %v296_v2 = vld [vmem:[#allocation5 + $0x48] sm:$0xff]   ;;  %s388_s13 = smov [#allocation7]  }
  0x28   :  { %v295_v1 = vld [vmem:[#allocation5] sm:$0xff]   ;;  %263 = vmatprep.subr.bf16.mxu0 %v294_v0  ;;  %v297_v3 = vld [vmem:[#allocation5 + $0x8] sm:$0xff]   ;;  %v298_v4 = vld [vmem:[#allocation5 + $0x50] sm:$0xff]   ;;  %s233_s14 = sshll.u32 %s388_s13, 4  ;;  %s234_s14 = int_to_ptr.vmem [resolvable:$true] %s233_s14 }
  0x29   :  { %264 = vmatpush3.bf16.msra.mxu0 %v295_v1  ;;  %v299_v5 = vld [vmem:[#allocation5 + $0x10] sm:$0xff]   ;;  %v300_v6 = vld [vmem:[#allocation5 + $0x58] sm:$0xff]   ;;  %v302_v8 = vld [vmem:[#allocation5 + $0x60] sm:$0xff]   ;;  %s354_s15 = scalar_lea.vmem %s234_s14, 256  ;;  %p359_p3 = scmp.lt.s32.totalorder %s234_s14, %s234_s14 }
  0x2a   :  { %265 = vmatprep.subr.bf16.mxu0 %v296_v2  ;;  %v301_v7 = vld [vmem:[#allocation5 + $0x18] sm:$0xff]   ;;  %v303_v9 = vld [vmem:[#allocation5 + $0x20] sm:$0xff]   ;;  %v304_v10 = vld [vmem:[#allocation5 + $0x68] sm:$0xff]   ;;  %p355_p2 = scmp.ne.s32.totalorder %s234_s14, %s354_s15  ;;  %p360_p4 = scmp.lt.s32.totalorder %s354_s15, %s354_s15 }
  0x2b   :  { %v45_v11 = vld [vmem:[#allocation2 + $0x8] sm:$0xff]  ;;  %v47_v12 = vld [vmem:[#allocation2 + $0x18] sm:$0xff]  ;;  %v306_v15 = vld [vmem:[#allocation5 + $0x70] sm:$0xff]  }
  0x2c   :  { %v49_v13 = vpack.c.bf16 %v47_v12, %v45_v11  ;;  %v305_v14 = vld [vmem:[#allocation5 + $0x28] sm:$0xff]   ;;  %v307_v16 = vld [vmem:[#allocation5 + $0x30] sm:$0xff]   ;;  %v308_v17 = vld [vmem:[#allocation5 + $0x78] sm:$0xff]   ;;  %p361_p5 = por %p360_p4, %p359_p3 }
  0x2d   :  { %266 = vmatpush3.bf16.msra.mxu0 %v297_v3  ;;  %v309_v18 = vld [vmem:[#allocation5 + $0x38] sm:$0xff]   ;;  %v44_v19 = vld [vmem:[#allocation2] sm:$0xff]  ;;  %v46_v20 = vld [vmem:[#allocation2 + $0x10] sm:$0xff] }
  0x2e   :  { %267 = vmatprep.subr.bf16.mxu0 %v298_v4  ;;  %217 = vmatprep.mubr.bf16.mxu0 %v49_v13  ;;  %v48_v21 = vpack.c.bf16 %v46_v20, %v44_v19  ;;  %v246_v23 = vld [vmem:[%s452_s2] ss:$0 sm:$0xff]  ;;  %p362_p6 = pnand %p361_p5, %p355_p2 }
  0x31   :  { %268 = vmatpush3.bf16.msra.mxu0 %v299_v5 }
  0x32   :  { %269 = vmatprep.subr.bf16.mxu0 %v300_v6 }
  0x35   :  { %270 = vmatpush3.bf16.msra.mxu0 %v301_v7 }
  0x36   :  { %271 = vmatprep.subr.bf16.mxu0 %v302_v8 }
  0x39   :  { %272 = vmatpush3.bf16.msra.mxu0 %v303_v9 }
  0x3a   :  { %273 = vmatprep.subr.bf16.mxu0 %v304_v10 }
  0x3d   :  { %274 = vmatpush3.bf16.msra.mxu0 %v305_v14 }
  0x3e   :  { %275 = vmatprep.subr.bf16.mxu0 %v306_v15 }
  0x41   :  { %276 = vmatpush3.bf16.msra.mxu0 %v307_v16 }
  0x42   :  { %277 = vmatprep.subr.bf16.mxu0 %v308_v17 }
  0x45   :  { %278 = vmatpush3.bf16.msra.mxu0 %v309_v18 }
  0x48   :  { %218 = vmatmul.mubr.bf16.vlgmr.msra.gmra.mrb[0].mxu0 %v48_v21 }
 0x11b   :  { %v279_v22 = vpop.f32.mrb[0].mxu0 }
 0x11c   :  { %v280_v24 = vpop.f32.mrb[1].mxu0 }
 0x11d   :  { %v281_v25 = vadd.f32 %v280_v24, %v279_v22  ;;  %v282_v26 = vpop.f32.mrb[2].mxu0 }
 0x11e   :  { %v283_v27 = vpop.f32.mrb[3].mxu0 }
 0x11f   :  { %v220_v28 = vadd.f32 %v281_v25, %v246_v23  ;;  %v284_v29 = vadd.f32 %v283_v27, %v282_v26 }
 0x121   :  { %226 = vst [vmem:[#allocation7] sm:$0xff] %v220_v28  ;;  %v223_v30 = vadd.f32 %v284_v29, %v246_v23 }
 0x123   :  { %227 = vst [vmem:[#allocation7 + $0x8] sm:$0xff] %v223_v30 }
 0x124   :  { %365 = shalt.err (!%p362_p6)
}
 0x125   :  { %s366_s17 = scalar_lea.hbm %s453_s3, 256 }
 0x126   :  { %p367_p7 = scmp.ne.s32.totalorder %s453_s3, %s366_s17  ;;  %p370_p8 = scmp.lt.u32.totalorder %s366_s17, %s453_s3 }
 0x128   :  { %p372_p9 = pnand %p370_p8, %p367_p7 }
 0x12a   :  { %375 = shalt.err (!%p372_p9)
}
 0x12b   :  { %s389_s22 = smov 128   ;;  %s390_s23 = smov 8  }
 0x12c   :  { %239 = dma.vmem_to_hbm [thread:$0]  %s234_s14, 256, %s453_s3, [#allocation4], %s389_s22, %s389_s22, %s390_s23  }
 0x12d   :  { %380 = dma.done.wait [#allocation4], 256  }
 0x12e   :  { %381 = vsyncadd [#allocation4], 4294967040 }
 0x12f   :  { %243 = vsyncpa [#allocation3], 1 }
 0x130   :  { %244 = vsyncpa [#allocation6], 1 }
 0x131   :  { %245 = vsyncpa [#allocation4], 1 }

</bundles_post_ra>
